<compile_context>
chip_gen: v6e
topology: v6e:2x2x1
jax: 0.10.0
libtpu: 0.0.40
codegen_flags: <defaults>
</compile_context>

<pallas_src>
import functools

import jax
import jax.numpy as jnp
from jax.experimental import pallas as pl
from jax.experimental.pallas import tpu as pltpu


# ----------------------------------------------------------------------------
# Pallas kernels: fused GEMM + shift (BN folded into W) + (residual) + act
# ----------------------------------------------------------------------------
def _apply_act(y, act):
    if act == "relu":
        return jnp.maximum(y, 0.0)
    if act == "leaky":
        return jnp.where(y > 0, y, 0.1 * y)
    if act == "sigmoid":
        return jax.nn.sigmoid(y)
    return y


def _gemm_kernel(x_ref, w_ref, b_ref, o_ref, acc_ref, *, act):
    k = pl.program_id(2)

    @pl.when(k == 0)
    def _():
        acc_ref[...] = jnp.zeros_like(acc_ref)

    acc_ref[...] += jnp.dot(x_ref[...], w_ref[...],
                            preferred_element_type=jnp.float32)

    @pl.when(k == pl.num_programs(2) - 1)
    def _():
        y = acc_ref[...] + b_ref[...]
        o_ref[...] = _apply_act(y, act).astype(o_ref.dtype)


def _gemm_res_kernel(x_ref, w_ref, b_ref, r_ref, o_ref, acc_ref, *, act):
    k = pl.program_id(2)

    @pl.when(k == 0)
    def _():
        acc_ref[...] = jnp.zeros_like(acc_ref)

    acc_ref[...] += jnp.dot(x_ref[...], w_ref[...],
                            preferred_element_type=jnp.float32)

    @pl.when(k == pl.num_programs(2) - 1)
    def _():
        y = acc_ref[...] + b_ref[...] + r_ref[...].astype(jnp.float32)
        o_ref[...] = _apply_act(y, act).astype(o_ref.dtype)


def _round_up(x, m):
    return (x + m - 1) // m * m


def fused_matmul(x, w, shift, *, act="none", residual=None,
                 out_dtype=jnp.bfloat16):
    """y = act( x @ w + shift [+ residual] ) with bf16 MXU inputs, f32 acc."""
    M, K = x.shape
    K2, N = w.shape
    assert K == K2

    tm = min(256, _round_up(M, 8))
    tn = min(256, _round_up(N, 128))
    tk = min(512, _round_up(K, 128))
    Mp = _round_up(M, tm)
    Np = _round_up(N, tn)
    Kp = _round_up(K, tk)

    xp = jnp.pad(x.astype(jnp.bfloat16), ((0, Mp - M), (0, Kp - K)))
    wp = jnp.pad(w.astype(jnp.bfloat16), ((0, Kp - K), (0, Np - N)))
    bp = jnp.pad(shift.astype(jnp.float32), (0, Np - N)).reshape(1, Np)

    in_specs = [
        pl.BlockSpec((tm, tk), lambda i, j, k: (i, k)),
        pl.BlockSpec((tk, tn), lambda i, j, k: (k, j)),
        pl.BlockSpec((1, tn), lambda i, j, k: (0, j)),
    ]
    args = [xp, wp, bp]
    if residual is not None:
        rp = jnp.pad(residual.astype(jnp.bfloat16),
                     ((0, Mp - M), (0, Np - N)))
        in_specs.append(pl.BlockSpec((tm, tn), lambda i, j, k: (i, j)))
        args.append(rp)
        kernel = functools.partial(_gemm_res_kernel, act=act)
    else:
        kernel = functools.partial(_gemm_kernel, act=act)

    out_bytes = Mp * Np * jnp.dtype(out_dtype).itemsize
    cost = pl.CostEstimate(
        flops=2 * Mp * Np * Kp,
        transcendentals=Mp * Np if act == "sigmoid" else 0,
        bytes_accessed=2 * (Mp * Kp + Kp * Np) + out_bytes,
    )

    out = pl.pallas_call(
        kernel,
        out_shape=jax.ShapeDtypeStruct((Mp, Np), out_dtype),
        grid_spec=pltpu.PrefetchScalarGridSpec(
            num_scalar_prefetch=0,
            grid=(Mp // tm, Np // tn, Kp // tk),
            in_specs=in_specs,
            out_specs=pl.BlockSpec((tm, tn), lambda i, j, k: (i, j)),
            scratch_shapes=[pltpu.VMEM((tm, tn), jnp.float32)],
        ),
        compiler_params=pltpu.CompilerParams(
            dimension_semantics=("parallel", "parallel", "arbitrary")),
        cost_estimate=cost,
    )(*args)
    return out[:M, :N]


# ----------------------------------------------------------------------------
# Glue: im2col (bf16), conv / deconv / linear wrappers (plain JAX)
# ----------------------------------------------------------------------------
def im2col(x, ksize=3, stride=1, pad=1):
    """x: NHWC -> patches [B*Ho*Wo, ksize*ksize*C] (tap-major, then channel)."""
    B, H, W, C = x.shape
    xp = jnp.pad(x, ((0, 0), (pad, pad), (pad, pad), (0, 0)))
    Ho = (H + 2 * pad - ksize) // stride + 1
    Wo = (W + 2 * pad - ksize) // stride + 1
    patches = []
    for di in range(ksize):
        for dj in range(ksize):
            patches.append(
                xp[:, di:di + stride * Ho:stride, dj:dj + stride * Wo:stride, :])
    cols = jnp.stack(patches, axis=3)          # [B, Ho, Wo, k*k, C]
    return cols.reshape(B * Ho * Wo, ksize * ksize * C), (B, Ho, Wo)


def im2col_2x2(x):
    """2x2 patches (pad bottom/right by 1) for the parity-combined deconv GEMM."""
    B, H, W, C = x.shape
    xp = jnp.pad(x, ((0, 0), (0, 1), (0, 1), (0, 0)))
    patches = [xp[:, di:di + H, dj:dj + W, :] for di in (0, 1) for dj in (0, 1)]
    cols = jnp.stack(patches, axis=3)          # [B, H, W, 4, C]
    return cols.reshape(B * H * W, 4 * C)


def conv_bn_act(x, w_mat, shift, *, stride=1, act="none", residual=None,
                out_dtype=jnp.bfloat16):
    """3x3 Conv2d (padding=1) + folded BN + activation, optional residual."""
    cols, (B, Ho, Wo) = im2col(x, ksize=3, stride=stride, pad=1)
    res = None
    if residual is not None:
        res = residual.reshape(B * Ho * Wo, residual.shape[-1])
    y = fused_matmul(cols, w_mat, shift, act=act, residual=res,
                     out_dtype=out_dtype)
    return y.reshape(B, Ho, Wo, -1)


def deconv_bn_act(x, w_eq, shift4, *, act="none", out_dtype=jnp.bfloat16):
    """ConvTranspose2d(k=3, s=2, p=1, output_padding=1) + folded BN + act.

    Implemented as one GEMM over a 2x2 im2col of the undilated input with a
    parity-combined [4*Cin, 4*Cout] weight, followed by pixel shuffle.
    """
    B, H, W, C = x.shape
    Cout = w_eq.shape[1] // 4
    cols = im2col_2x2(x)
    y = fused_matmul(cols, w_eq, shift4, act=act, out_dtype=out_dtype)
    y = y.reshape(B, H, W, 2, 2, Cout)
    y = jnp.transpose(y, (0, 1, 3, 2, 4, 5)).reshape(B, 2 * H, 2 * W, Cout)
    return y


def basic_block(x, p):
    h = conv_bn_act(x, p["w1"], p["s1"], stride=1, act="relu")
    return conv_bn_act(h, p["w2"], p["s2"], stride=1, act="relu", residual=x)


# ----------------------------------------------------------------------------
# One-time parameter preparation: fold BN, transpose, cast to bf16
# ----------------------------------------------------------------------------
def fold_bn(bias, bn):
    """Fold conv bias + eval-mode BatchNorm into per-channel scale/shift."""
    if bn is None:
        return jnp.ones_like(bias), bias
    inv = 1.0 / jnp.sqrt(bn["var"] + bn["eps"])
    scale = bn["gamma"] * inv
    shift = bn["beta"] + (bias - bn["mean"]) * scale
    return scale, shift


def prep_conv(w, b, bn):
    """Conv2d weight [Cout,Cin,3,3] -> BN-scaled GEMM matrix [9*Cin, Cout]."""
    scale, shift = fold_bn(b, bn)
    w_mat = jnp.transpose(w, (2, 3, 1, 0)).reshape(-1, w.shape[0]) * scale[None, :]
    return w_mat.astype(jnp.bfloat16), shift.astype(jnp.float32)


def prep_deconv(w_t, b, bn):
    """ConvT weight [Cin,Cout,3,3] -> parity-combined matrix [4*Cin, 4*Cout].

    Output column block (py, px) holds the weights producing output pixel
    (2i+py, 2j+px); row block (di, dj) multiplies input x[i+di, j+dj].
    Valid kernel tap: (py+1-2*di, px+1-2*dj); others are zero.
    """
    Cin, Cout = w_t.shape[0], w_t.shape[1]
    scale, shift = fold_bn(b, bn)
    w_s = w_t * scale[None, :, None, None]
    zero = jnp.zeros((Cin, Cout), jnp.float32)
    row_blocks = []
    for di in (0, 1):
        for dj in (0, 1):
            cols = []
            for py in (0, 1):
                for px in (0, 1):
                    kr, kc = py + 1 - 2 * di, px + 1 - 2 * dj
                    cols.append(w_s[:, :, kr, kc] if (kr >= 0 and kc >= 0)
                                else zero)
            row_blocks.append(jnp.concatenate(cols, axis=1))   # [Cin, 4*Cout]
    w_eq = jnp.concatenate(row_blocks, axis=0)                 # [4*Cin, 4*Cout]
    shift4 = jnp.tile(shift, 4)
    return w_eq.astype(jnp.bfloat16), shift4.astype(jnp.float32)


def prep_linear(w, b):
    return w.T.astype(jnp.bfloat16), b.astype(jnp.float32)


def prep_block(p):
    w1, s1 = prep_conv(p["w1"], p["b1"], p["bn1"])
    w2, s2 = prep_conv(p["w2"], p["b2"], p["bn2"])
    return dict(w1=w1, s1=s1, w2=w2, s2=s2)


def prepare_params(raw):
    pp = {"initial": prep_block(raw["initial"])}
    enc = []
    for st in raw["enc_stages"]:
        cw, cs = prep_conv(st["cw"], st["cb"], st["bn"])
        enc.append(dict(cw=cw, cs=cs, block=prep_block(st["block"])))
    pp["enc_stages"] = enc
    pp["enc_last_w"], pp["enc_last_s"] = prep_conv(
        raw["enc_last_w"], raw["enc_last_b"], raw["enc_last_bn"])
    pp["enc_fc_w"], pp["enc_fc_s"] = prep_linear(raw["enc_fc_w"], raw["enc_fc_b"])
    pp["dec_fc_w"], pp["dec_fc_s"] = prep_linear(raw["dec_fc_w"], raw["dec_fc_b"])
    dec = []
    for st in raw["dec_stages"]:
        w_eq, s4 = prep_deconv(st["w"], st["b"], st["bn"])
        dec.append(dict(w=w_eq, s=s4))
    pp["dec_stages"] = dec
    pp["dec_last_w"], pp["dec_last_s"] = prep_deconv(
        raw["dec_last_w"], raw["dec_last_b"], None)
    return pp


# ----------------------------------------------------------------------------
# Deterministic raw (PyTorch-style) parameter construction
# ----------------------------------------------------------------------------
class KeyGen:
    def __init__(self, seed=0):
        self._key = jax.random.PRNGKey(seed)

    def __call__(self):
        self._key, k = jax.random.split(self._key)
        return k


def conv_p(kg, cin, cout, k=3):
    fan_in = cin * k * k
    bound = 1.0 / (fan_in ** 0.5)
    w = jax.random.uniform(kg(), (cout, cin, k, k), jnp.float32, -bound, bound)
    b = jax.random.uniform(kg(), (cout,), jnp.float32, -bound, bound)
    return w, b


def deconv_p(kg, cin, cout, k=3):
    fan_in = cin * k * k
    bound = 1.0 / (fan_in ** 0.5)
    w = jax.random.uniform(kg(), (cin, cout, k, k), jnp.float32, -bound, bound)
    b = jax.random.uniform(kg(), (cout,), jnp.float32, -bound, bound)
    return w, b


def linear_p(kg, fin, fout):
    bound = 1.0 / (fin ** 0.5)
    w = jax.random.uniform(kg(), (fout, fin), jnp.float32, -bound, bound)
    b = jax.random.uniform(kg(), (fout,), jnp.float32, -bound, bound)
    return w, b


def bn_p(kg, c):
    return dict(gamma=1.0 + 0.1 * jax.random.normal(kg(), (c,), jnp.float32),
                beta=0.1 * jax.random.normal(kg(), (c,), jnp.float32),
                mean=jnp.zeros((c,), jnp.float32),
                var=jnp.ones((c,), jnp.float32),
                eps=1e-5)


def basic_block_p(kg, c):
    w1, b1 = conv_p(kg, c, c)
    w2, b2 = conv_p(kg, c, c)
    return dict(w1=w1, b1=b1, bn1=bn_p(kg, c), w2=w2, b2=b2, bn2=bn_p(kg, c))


def make_params(seed=0):
    kg = KeyGen(seed)
    params = {"initial": basic_block_p(kg, 3)}

    enc_stages = []
    for cin, cout in [(3, 64), (64, 128), (128, 256), (256, 512), (512, 1024)]:
        cw, cb = conv_p(kg, cin, cout)
        enc_stages.append(dict(cw=cw, cb=cb, bn=bn_p(kg, cout),
                               block=basic_block_p(kg, cout)))
    params["enc_stages"] = enc_stages

    params["enc_last_w"], params["enc_last_b"] = conv_p(kg, 1024, 1024)
    params["enc_last_bn"] = bn_p(kg, 1024)
    params["enc_fc_w"], params["enc_fc_b"] = linear_p(kg, 1024 * 4 * 4, 256)

    params["dec_fc_w"], params["dec_fc_b"] = linear_p(kg, 256, 1024 * 4 * 4)
    dec_stages = []
    for cin, cout in [(1024, 1024), (1024, 512), (512, 256), (256, 128), (128, 64)]:
        w, b = deconv_p(kg, cin, cout)
        dec_stages.append(dict(w=w, b=b, bn=bn_p(kg, cout)))
    params["dec_stages"] = dec_stages
    params["dec_last_w"], params["dec_last_b"] = deconv_p(kg, 64, 3)
    return params


# ----------------------------------------------------------------------------
# Full Autoencoder5 forward
# ----------------------------------------------------------------------------
def autoencoder5_forward(x_nchw, pp):
    x = jnp.transpose(x_nchw, (0, 2, 3, 1)).astype(jnp.bfloat16)  # NCHW -> NHWC
    B = x.shape[0]

    # initial_block
    x = basic_block(x, pp["initial"])

    # encoder
    for st in pp["enc_stages"]:
        x = conv_bn_act(x, st["cw"], st["cs"], stride=2, act="leaky")
        x = basic_block(x, st["block"])
    x = conv_bn_act(x, pp["enc_last_w"], pp["enc_last_s"], stride=2, act="none")
    # Flatten in PyTorch NCHW (C, H, W) order, then Linear
    x = jnp.transpose(x, (0, 3, 1, 2)).reshape(B, -1)
    x = fused_matmul(x, pp["enc_fc_w"], pp["enc_fc_s"], act="none")

    # decoder
    x = fused_matmul(x, pp["dec_fc_w"], pp["dec_fc_s"], act="none")
    x = x.reshape(B, 1024, 4, 4)
    x = jnp.transpose(x, (0, 2, 3, 1))  # back to NHWC
    for st in pp["dec_stages"]:
        x = deconv_bn_act(x, st["w"], st["s"], act="leaky")
    x = deconv_bn_act(x, pp["dec_last_w"], pp["dec_last_s"], act="sigmoid",
                      out_dtype=jnp.float32)
    return jnp.transpose(x, (0, 3, 1, 2))  # NHWC -> NCHW


if __name__ == "__main__":
    # The Linear(1024*4*4, 256) after six stride-2 convs implies 256x256 input.
    B, C, H, W = 1, 3, 256, 256
    key = jax.random.PRNGKey(0)
    x = jax.random.uniform(key, (B, C, H, W), jnp.float32)

    raw = make_params(seed=0)
    params = prepare_params(raw)          # BN fold / transpose / bf16 cast: once

    out = autoencoder5_forward(x, params)
    out = jax.block_until_ready(out)

    assert out.shape == (B, 3, 256, 256), out.shape
    assert out.dtype == jnp.float32
    assert bool(jnp.all(jnp.isfinite(out)))
    assert bool(jnp.all((out >= 0.0) & (out <= 1.0)))  # sigmoid output range
    print("KERNEL_OK")
</pallas_src>

<mosaic_0001>
module attributes {stable_mosaic.version = 11 : i64} {
  func.func @_gemm_kernel(%arg0: i32, %arg1: i32, %arg2: i32, %arg3: memref<256x128xbf16, #tpu.memory_space<vmem>>, %arg4: memref<128x128xbf16, #tpu.memory_space<vmem>>, %arg5: memref<1x128xf32, #tpu.memory_space<vmem>>, %arg6: memref<256x128xbf16, #tpu.memory_space<vmem>>, %arg7: memref<256x128xf32, #tpu.memory_space<vmem>>) attributes {dimension_semantics = [#tpu.dimension_semantics<parallel>, #tpu.dimension_semantics<parallel>, #tpu.dimension_semantics<arbitrary>], iteration_bounds = array<i64: 256, 1, 1>, scalar_prefetch = 0 : i64, scratch_operands = 1 : i64, tpu.core_type = #tpu.core_type<tc>, window_params = [{transform_indices = @transform_0, window_bounds = array<i64: 256, 128>}, {transform_indices = @transform_1, window_bounds = array<i64: 128, 128>}, {transform_indices = @transform_2, window_bounds = array<i64: 1, 128>}, {transform_indices = @transform_3, window_bounds = array<i64: 256, 128>}]} {
    %c0_i32 = arith.constant 0 : i32
    %0 = arith.cmpi eq, %arg2, %c0_i32 : i32
    %1 = arith.extui %0 : i1 to i32
    %c0_i32_0 = arith.constant 0 : i32
    %2 = arith.cmpi ne, %1, %c0_i32_0 : i32
    scf.if %2 {
      %cst_10 = arith.constant 0.000000e+00 : f32
      %12 = vector.broadcast %cst_10 : f32 to vector<256x128xf32>
      %c0_11 = arith.constant 0 : index
      %c0_12 = arith.constant 0 : index
      %13 = vector.load %arg7[%c0_11, %c0_12] : memref<256x128xf32, #tpu.memory_space<vmem>>, vector<256x128xf32>
      tpu.vector_store %arg7[%c0_11, %c0_12], %12 {strides = array<i32>} : memref<256x128xf32, #tpu.memory_space<vmem>>, vector<256x128xf32>,
    } else {
    }
    %c0 = arith.constant 0 : index
    %c0_1 = arith.constant 0 : index
    %3 = vector.load %arg7[%c0, %c0_1] : memref<256x128xf32, #tpu.memory_space<vmem>>, vector<256x128xf32>
    %c0_2 = arith.constant 0 : index
    %c0_3 = arith.constant 0 : index
    %4 = vector.load %arg3[%c0_2, %c0_3] : memref<256x128xbf16, #tpu.memory_space<vmem>>, vector<256x128xbf16>
    %c0_4 = arith.constant 0 : index
    %c0_5 = arith.constant 0 : index
    %5 = vector.load %arg4[%c0_4, %c0_5] : memref<128x128xbf16, #tpu.memory_space<vmem>>, vector<128x128xbf16>
    %cst = arith.constant dense<0.000000e+00> : vector<256x128xf32>
    %6 = tpu.matmul %4, %5, %cst {dimension_numbers = #tpu.dot_dimension_numbers<[1], [0], [0], [1], [0, 0, 1, 1], [], []>} : vector<256x128xbf16>, vector<128x128xbf16>, vector<256x128xf32> -> vector<256x128xf32>
    %7 = arith.addf %3, %6 : vector<256x128xf32>
    %c0_6 = arith.constant 0 : index
    %c0_7 = arith.constant 0 : index
    %8 = vector.load %arg7[%c0_6, %c0_7] : memref<256x128xf32, #tpu.memory_space<vmem>>, vector<256x128xf32>
    tpu.vector_store %arg7[%c0_6, %c0_7], %7 {strides = array<i32>} : memref<256x128xf32, #tpu.memory_space<vmem>>, vector<256x128xf32>,
    %c0_i32_8 = arith.constant 0 : i32
    %9 = arith.cmpi eq, %arg2, %c0_i32_8 : i32
    %10 = arith.extui %9 : i1 to i32
    %c0_i32_9 = arith.constant 0 : i32
    %11 = arith.cmpi ne, %10, %c0_i32_9 : i32
    scf.if %11 {
      %c0_10 = arith.constant 0 : index
      %c0_11 = arith.constant 0 : index
      %12 = vector.load %arg7[%c0_10, %c0_11] : memref<256x128xf32, #tpu.memory_space<vmem>>, vector<256x128xf32>
      %c0_12 = arith.constant 0 : index
      %c0_13 = arith.constant 0 : index
      %13 = vector.load %arg5[%c0_12, %c0_13] : memref<1x128xf32, #tpu.memory_space<vmem>>, vector<1x128xf32>
      %14 = vector.broadcast %13 : vector<1x128xf32> to vector<256x128xf32>
      %15 = arith.addf %12, %14 : vector<256x128xf32>
      %cst_14 = arith.constant 0.000000e+00 : f32
      %16 = vector.broadcast %cst_14 : f32 to vector<256x128xf32>
      %17 = arith.maximumf %15, %16 : vector<256x128xf32>
      %18 = arith.truncf %17 : vector<256x128xf32> to vector<256x128xbf16>
      %c0_15 = arith.constant 0 : index
      %c0_16 = arith.constant 0 : index
      %19 = vector.load %arg6[%c0_15, %c0_16] : memref<256x128xbf16, #tpu.memory_space<vmem>>, vector<256x128xbf16>
      tpu.vector_store %arg6[%c0_15, %c0_16], %18 {strides = array<i32>} : memref<256x128xbf16, #tpu.memory_space<vmem>>, vector<256x128xbf16>,
    } else {
    }
    return
  }
  func.func @transform_0(%arg0: i32, %arg1: i32, %arg2: i32) -> (i32, i32) {
    %c0_i32 = arith.constant 0 : i32
    return %arg0, %arg2 : i32, i32
  }
  func.func @transform_1(%arg0: i32, %arg1: i32, %arg2: i32) -> (i32, i32) {
    %c0_i32 = arith.constant 0 : i32
    return %arg2, %arg1 : i32, i32
  }
  func.func @transform_2(%arg0: i32, %arg1: i32, %arg2: i32) -> (i32, i32) {
    %c0_i32 = arith.constant 0 : i32
    %c0_i32_0 = arith.constant 0 : i32
    return %c0_i32, %arg1 : i32, i32
  }
  func.func @transform_3(%arg0: i32, %arg1: i32, %arg2: i32) -> (i32, i32) {
    %c0_i32 = arith.constant 0 : i32
    return %arg0, %arg1 : i32, i32
  }
}

</mosaic_0001>

<bundles_post_ra>
// kernel: tpu_custom_call.1
= control target key start
LH: loop header
LB: loop body
LE: loop exit
PB: predicated region body
PF: predicated region fallthrough
CT: control target
= control target key end

     0   :  { %8 = vsyncpa [#allocation4], 0  ;;  %s2006_s0 = inlined_call_operand.hbm [shape: bf16[65536,128], index: 0, kind: input, shape index: {}]   ;;  %s2007_s1 = inlined_call_operand.hbm [shape: bf16[128,128], index: 1, kind: input, shape index: {}]   ;;  %s2008_s2 = inlined_call_operand.hbm [shape: f32[1,128], index: 2, kind: input, shape index: {}]   ;;  %s2009_s3 = inlined_call_operand.hbm [shape: bf16[65536,128], index: 3, kind: output, shape index: {}]  }
   0x1   :  { %10 = vsyncpa [#allocation4 + $0x1], 0 }
   0x2   :  { %11 = vsyncpa [#allocation7], 0 }
   0x3   :  { %12 = vsyncpa [#allocation5], 0 }
   0x4   :  { %14 = vsyncpa [#allocation5 + $0x1], 0  ;;  %s1739_s12 = smov 0   ;;  %s1741_s13 = smov 0  }
   0x5   :  { %s1743_s14 = smov 0   ;;  %s1745_s15 = smov 0  }
   0x6   :  { %s1747_s16 = smov 0   ;;  %s1749_s17 = smov 0  }
   0x7 LB: > { %s1141_s18 = sadd.s32 4294967295, %s1709_s17   ;;  %s1142_s19 = sadd.s32 4294967294, %s1709_s17   ;;  %s1709_s17 = sphi %s1749_s17, %s20_s17   ;;  %s1705_s16 = sphi %s1747_s16, %s2025_s16   ;;  %s1701_s15 = sphi %s1745_s15, %s2024_s15   ;;  %s1697_s14 = sphi %s1743_s14, %s2023_s14   ;;  %s1693_s13 = sphi %s1741_s13, %s2022_s13   ;;  %s1689_s12 = sphi %s1739_s12, %s2021_s12  }
   0x8   : > { %p61_p0 = scmp.ne.s32.totalorder %s1693_s13, %s1689_s12  ;;  %p1773_p1 = scmp.eq.s32.totalorder %s1141_s18, 0 }
   0x9   : > { %p1777_p2 = scmp.eq.s32.totalorder %s1141_s18, 255  ;;  %p147_p3 = scmp.eq.s32.totalorder %s1142_s19, 255 }
   0xa   : > { %p1783_p4 = por %p1773_p1, %p61_p0  ;;  %p1143_p5 = scmp.ge.s32.totalorder %s1709_s17, 1 }
   0xb   : > { %p1788_p6 = por %p147_p3, %p61_p0  ;;  %p154_p7 = scmp.lt.s32.totalorder %s1709_s17, 257 }
   0xc   : > { %s1711_s25 = smov [#allocation6]   ;;  %s1712_s28 = smov [#allocation8]  }
   0xd   : > { %s2014_s23 = scalar_select %p1788_p6, 1, 0 }
   0xe   : > { %p1793_p8 = pnand %p1143_p5, %p154_p7  ;;  %s170_s26 = sshll.u32 %s1711_s25, 4  ;;  %s171_s26 = int_to_ptr.vmem [resolvable:$true] %s170_s26 }
   0xf   : > { %s186_s29 = sshll.u32 %s1712_s28, 4  ;;  %s1556_s30 = scalar_lea.vmem %s171_s26, 1024  ;;  %s187_s29 = int_to_ptr.vmem [resolvable:$true] %s186_s29 }
  0x10   : > { %p1446_p9 = pneg %p1793_p8  ;;  %p1557_p12 = scmp.ne.s32.totalorder %s171_s26, %s1556_s30 }
  0x11   : > { %p1564_p3 = scmp.lt.s32.totalorder %s171_s26, %s171_s26  ;;  %p1565_p5 = scmp.lt.s32.totalorder %s1556_s30, %s1556_s30 }
  0x12   : > { %p1801_p10 = pnand %p1446_p9, %p1773_p1 }
  0x13   : > { %p1566_p7 = por %p1565_p5, %p1564_p3 }
  0x14   : > { %p1547_p11 = pneg %p1801_p10 }
  0x16   : > { %p1559_p13 = pnand %p1557_p12, %p1547_p11 }
  0x18   : > { %p1560_p0 = pneg %p1559_p13 }
  0x1a   : > { %p1567_p9 = pnand %p1566_p7, %p1560_p0 }
  0x1c   : > { %1570 = shalt.err (!%p1567_p9)
}
  0x1d   : > { %s2010_s4 = smov 64   ;;  %s1714_s5 = smov 4  }
  0x1e   : > { %1449 = dma.hbm_to_vmem [thread:$0]  (!%p1801_p10), %s2007_s1, 1024, %s171_s26, [#allocation7], %s2010_s4, %s2010_s4, %s1714_s5  }
  0x1f   : > { %s1582_s8 = scalar_lea.vmem %s187_s29, 16  ;;  %s1589_s9 = scalar_lea.vmem %s187_s29, 32 }
  0x20   : > { %p1583_p12 = scmp.ne.s32.totalorder %s187_s29, %s1582_s8  ;;  %p1590_p0 = scmp.lt.s32.totalorder %s187_s29, %s187_s29 }
  0x21   : > { %p1591_p5 = scmp.lt.s32.totalorder %s1589_s9, %s1582_s8 }
  0x22   : > { %p1585_p13 = pnand %p1583_p12, %p1547_p11 }
  0x23   : > { %p1592_p7 = por %p1591_p5, %p1590_p0 }
  0x24   : > { %p1586_p3 = pneg %p1585_p13 }
  0x26   : > { %p1593_p9 = pnand %p1592_p7, %p1586_p3 }
  0x28   : > { %1596 = shalt.err (!%p1593_p9)
}
  0x29   : > { %1452 = dma.hbm_to_vmem [thread:$0]  (!%p1801_p10), %s2008_s2, 16, %s187_s29, [#allocation7]  }
  0x2a   : > { %s39_s18 = sadd.s32 1, %s1705_s16  ;;  %s48_s19 = sadd.s32 1, %s1697_s14 }
  0x2b   : > { %p41_p11 = scmp.ge.s32.totalorder %s39_s18, 256  ;;  %p55_p12 = scmp.ne.s32.totalorder %s1697_s14, %s1693_s13 }
  0x2c   : > { %p56_p13 = scmp.eq.s32.totalorder %s1709_s17, 0  ;;  %p1463_p3 = scmp.lt.s32.totalorder %s1709_s17, 256 }
  0x2d   : > { %s2027_s18 = smov (%p41_p11, %s39_s18), 0  ;;  %p1836_p5 = por %p1777_p2, %p55_p12 }
  0x2e   : > { %p57_p0 = por %p56_p13, %p55_p12  ;;  %s43_s26 = ssub.s32 %s1705_s16, %s2027_s18 }
  0x2f   : > { %s197_s27 = sand.u32 1, %s1697_s14   ;;  %p46_p7 = scmp.eq.s32.totalorder %s43_s26, 0 }
  0x30   : > { %s1147_s28 = sshll.u32 %s197_s27, 7  ;;  %s1217_s29 = sshll.u32 %s1705_s16, 11 }
  0x31   : > { %s1845_s30 = scalar_select %p46_p7, %s1697_s14, %s48_s19  }
  0x32   : > { %s208_s8 = scalar_lea.hbm %s2006_s0, %s1217_s29  ;;  %s201_s9 = scalar_lea.vmem [#allocation3], %s1147_s28 }
  0x33   : > { %s209_s10 = sshll.u32 %s201_s9, 4  ;;  %p1852_p10 = pnand %p1463_p3, %p57_p0  ;;  %s210_s10 = int_to_ptr.vmem [resolvable:$true] %s209_s10 }
  0x34   : > { %s198_s11 = scalar_lea.sflag [#allocation4], %s197_s27  ;;  %s1610_s26 = scalar_lea.vmem %s210_s10, 2048 }
  0x35   : > { %p1599_p2 = pneg %p1852_p10  ;;  %p1611_p9 = scmp.ne.s32.totalorder %s210_s10, %s1610_s26 }
  0x36   : > { %s1715_s19 = smov [#allocation3]  }
  0x37   : > { %p1613_p11 = pnand %p1611_p9, %p1599_p2  ;;  %s1615_s4 = sshll.u32 %s1715_s19, 4  ;;  %s1616_s4 = int_to_ptr.vmem [resolvable:$false] %s1615_s4 }
  0x38   : > { %s1617_s29 = scalar_lea.vmem %s1616_s4, 4096  ;;  %p1618_p13 = scmp.lt.s32.totalorder %s210_s10, %s1616_s4 }
  0x39   : > { %p1614_p12 = pneg %p1613_p11  ;;  %p1619_p7 = scmp.lt.s32.totalorder %s1617_s29, %s1610_s26 }
  0x3b   : > { %p1620_p6 = por %p1619_p7, %p1618_p13 }
  0x3d   : > { %p1621_p3 = pnand %p1620_p6, %p1614_p12 }
  0x3f   : > { %1624 = shalt.err (!%p1621_p3)
}
  0x40   : > { %s2019_s28 = smov 64   ;;  %221 = sbr.rel (%p1793_p8) target bundleno = 348 (0x15c), region = 32 }
  0x41   : > { %1456 = dma.hbm_to_vmem [thread:$0]  (!%p1852_p10), %s208_s8, 2048, %s210_s10, %s198_s11, %s2019_s28, %s2019_s28, %s1714_s5  }
  0x42   : > { %s1866_s27 = sand.u32 (!%p1793_p8), 1, %s1693_s13  }
  0x43   : > { %s1151_s4 = sshll.u32 (!%p1793_p8), %s1866_s27, 7  ;;  %s224_s6 = scalar_lea.sflag (!%p1793_p8), [#allocation4], %s1866_s27 }
  0x44   : > { %s1872_s7 = scalar_lea.vmem (!%p1793_p8), [#allocation3], %s1151_s4 }
  0x45   : > { %1676 = dma.done.wait (%p1783_p4), %s224_s6, 2048  }
  0x46   : > { %1678 = vsyncadd (%p1783_p4), %s224_s6, 4294965248 }
  0x47   : > { %1680 = dma.done.wait (%p1773_p1), [#allocation7], 1040  }
  0x48   : > { %1682 = vsyncadd (%p1773_p1), [#allocation7], 4294966256  ;;  %v1521_v0 = vld [vmem:[#allocation6 + $0x38] sm:$0xff]   ;;  %v1522_v1 = vld [vmem:[#allocation6 + $0x30] sm:$0xff]   ;;  %s1912_s20 = scalar_lea.vmem [#allocation9], %s1151_s4  ;;  %s1250_s22 = sshll.u32 %s1701_s15, 11 }
  0x49   : > { %1370 = vmatprep.subr.bf16.mxu0 %v1521_v0  ;;  %1418 = vmatprep.subr.bf16.mxu1 %v1521_v0  ;;  %v1523_v2 = vld [vmem:[#allocation6 + $0x28] sm:$0xff]   ;;  %v1524_v3 = vld [vmem:[#allocation6 + $0x20] sm:$0xff]   ;;  %v1525_v6 = vld [vmem:[#allocation6 + $0x18] sm:$0xff]   ;;  %s1028_s24 = sshll.u32 %s1912_s20, 4  ;;  %s1953_s9 = scalar_lea.hbm %s2009_s3, %s1250_s22  ;;  %s1955_s24 = int_to_ptr.vmem [resolvable:$true] %s1028_s24 }
  0x4a   : > { %1371 = vmatpush3.bf16.msra.mxu0 %v1521_v0  ;;  %1426 = vmatpush3.bf16.msra.mxu1 %v1521_v0  ;;  %v1529_v4 = vld [vmem:[%s1872_s7] sm:$0xff]   ;;  %v1526_v7 = vld [vmem:[#allocation6 + $0x10] sm:$0xff]   ;;  %v1527_v8 = vld [vmem:[#allocation6 + $0x8] sm:$0xff]   ;;  %s1014_s15 = scalar_lea.sflag [#allocation5], %s1866_s27  ;;  %s1625_s10 = scalar_lea.vmem %s1955_s24, 2048 }
  0x4b   : > { %1372 = vmatprep.subr.bf16.mxu0 %v1522_v1  ;;  %1419 = vmatprep.subr.bf16.mxu1 %v1522_v1  ;;  %v1530_v5 = vld [vmem:[%s1872_s7 + $0x40] sm:$0xff]   ;;  %v1531_v10 = vld [vmem:[%s1872_s7 + $0x8] sm:$0xff]   ;;  %v1533_v12 = vld [vmem:[%s1872_s7 + $0x10] sm:$0xff]   ;;  %p1626_p1 = scmp.ne.s32.totalorder %s1955_s24, %s1625_s10  ;;  %s1716_s21 = smov [#allocation9]  }
  0x4c   : > { %1386 = vmatprep.mubr.bf16.mxu0 %v1529_v4  ;;  %1402 = vmatprep.mubr.bf16.mxu1 %v1530_v5  ;;  %v1528_v9 = vld [vmem:[#allocation6] sm:$0xff]   ;;  %v1532_v11 = vld [vmem:[%s1872_s7 + $0x48] sm:$0xff]   ;;  %v1534_v13 = vld [vmem:[%s1872_s7 + $0x50] sm:$0xff]   ;;  %s1629_s11 = sshll.u32 %s1716_s21, 4  ;;  %s1630_s11 = int_to_ptr.vmem [resolvable:$false] %s1629_s11 }
  0x4d   : > { %v1535_v14 = vld [vmem:[%s1872_s7 + $0x18] sm:$0xff]   ;;  %v1537_v16 = vld [vmem:[%s1872_s7 + $0x20] sm:$0xff]   ;;  %v1539_v18 = vld [vmem:[%s1872_s7 + $0x28] sm:$0xff]   ;;  %p1627_p4 = pnand %p1626_p1, %p1836_p5  ;;  %s1631_s26 = scalar_lea.vmem %s1630_s11, 4096 }
  0x4e   : > { %1373 = vmatpush3.bf16.msra.mxu0 %v1522_v1  ;;  %1427 = vmatpush3.bf16.msra.mxu1 %v1522_v1  ;;  %v1536_v15 = vld [vmem:[%s1872_s7 + $0x58] sm:$0xff]   ;;  %v1538_v17 = vld [vmem:[%s1872_s7 + $0x60] sm:$0xff]   ;;  %v1540_v19 = vld [vmem:[%s1872_s7 + $0x68] sm:$0xff]   ;;  %p1632_p8 = scmp.lt.s32.totalorder %s1955_s24, %s1630_s11  ;;  %p1633_p0 = scmp.lt.s32.totalorder %s1631_s26, %s1625_s10 }
  0x4f   : > { %1374 = vmatprep.subr.bf16.mxu0 %v1523_v2  ;;  %1420 = vmatprep.subr.bf16.mxu1 %v1523_v2  ;;  %v1541_v20 = vld [vmem:[%s1872_s7 + $0x30] sm:$0xff]   ;;  %v1543_v22 = vld [vmem:[%s1872_s7 + $0x38] sm:$0xff]   ;;  %v1898_v24 = vld [vmem:[#allocation8] ss:$0 sm:$0xff]  ;;  %p1628_p6 = pneg %p1627_p4 }
  0x50   : > { %v1542_v21 = vld [vmem:[%s1872_s7 + $0x70] sm:$0xff]   ;;  %v1544_v23 = vld [vmem:[%s1872_s7 + $0x78] sm:$0xff]   ;;  %p1634_p10 = por %p1633_p0, %p1632_p8 }
  0x52   : > { %1375 = vmatpush3.bf16.msra.mxu0 %v1523_v2  ;;  %1428 = vmatpush3.bf16.msra.mxu1 %v1523_v2  ;;  %p1635_p2 = pnand %p1634_p10, %p1628_p6 }
  0x53   : > { %1376 = vmatprep.subr.bf16.mxu0 %v1524_v3  ;;  %1421 = vmatprep.subr.bf16.mxu1 %v1524_v3 }
  0x56   : > { %1377 = vmatpush3.bf16.msra.mxu0 %v1524_v3  ;;  %1429 = vmatpush3.bf16.msra.mxu1 %v1524_v3 }
  0x57   : > { %1378 = vmatprep.subr.bf16.mxu0 %v1525_v6  ;;  %1422 = vmatprep.subr.bf16.mxu1 %v1525_v6 }
  0x5a   : > { %1379 = vmatpush3.bf16.msra.mxu0 %v1525_v6  ;;  %1430 = vmatpush3.bf16.msra.mxu1 %v1525_v6 }
  0x5b   : > { %1380 = vmatprep.subr.bf16.mxu0 %v1526_v7  ;;  %1423 = vmatprep.subr.bf16.mxu1 %v1526_v7 }
  0x5e   : > { %1381 = vmatpush3.bf16.msra.mxu0 %v1526_v7  ;;  %1431 = vmatpush3.bf16.msra.mxu1 %v1526_v7 }
  0x5f   : > { %1382 = vmatprep.subr.bf16.mxu0 %v1527_v8  ;;  %1424 = vmatprep.subr.bf16.mxu1 %v1527_v8 }
  0x62   : > { %1383 = vmatpush3.bf16.msra.mxu0 %v1527_v8  ;;  %1432 = vmatpush3.bf16.msra.mxu1 %v1527_v8 }
  0x63   : > { %1384 = vmatprep.subr.bf16.mxu0 %v1528_v9  ;;  %1425 = vmatprep.subr.bf16.mxu1 %v1528_v9 }
  0x66   : > { %1385 = vmatpush3.bf16.msra.mxu0 %v1528_v9  ;;  %1433 = vmatpush3.bf16.msra.mxu1 %v1528_v9 }
  0x69   : > { %1387 = vmatmul.mubr.bf16.vlgmr.msra.gmra.mxu0 %v1531_v10  ;;  %1403 = vmatmul.mubr.bf16.vlgmr.msra.gmra.mxu1 %v1532_v11 }
  0x6a   : > { %1390 = vmatprep.mubr.bf16.mxu0 %v1533_v12  ;;  %1406 = vmatprep.mubr.bf16.mxu1 %v1534_v13 }
  0x71   : > { %1391 = vmatmul.mubr.bf16.gmra.mxu0 %v1535_v14  ;;  %1407 = vmatmul.mubr.bf16.gmra.mxu1 %v1536_v15 }
  0x72   : > { %1394 = vmatprep.mubr.bf16.mxu0 %v1537_v16  ;;  %1410 = vmatprep.mubr.bf16.mxu1 %v1538_v17 }
  0x79   : > { %1395 = vmatmul.mubr.bf16.gmra.mxu0 %v1539_v18  ;;  %1411 = vmatmul.mubr.bf16.gmra.mxu1 %v1540_v19 }
  0x7a   : > { %1398 = vmatprep.mubr.bf16.mxu0 %v1541_v20  ;;  %1414 = vmatprep.mubr.bf16.mxu1 %v1542_v21 }
  0x81   : > { %1399 = vmatmul.mubr.bf16.gmra.mxu0 %v1543_v22  ;;  %1415 = vmatmul.mubr.bf16.gmra.mxu1 %v1544_v23 }
 0x129   : > { %v1388_v25 = vpop.f32.mrf.mxu0  ;;  %v1404_v26 = vpop.f32.mrf.mxu1 }
 0x12a   : > { %v791_v27 = vadd.f32 %v1388_v25, %v1898_v24  ;;  %v807_v28 = vadd.f32 %v1404_v26, %v1898_v24 }
 0x12b   : > { %v556_v29 = vpop.f32.mrf.mxu0  ;;  %v620_v30 = vpop.f32.mrf.mxu1 }
 0x12c   : > { %v789_v31 = vadd.f32 %v1898_v24, %v556_v29  ;;  %v805_v32 = vadd.f32 %v1898_v24, %v620_v30  ;;  %v823_v37 = vmax.f32 %v791_v27, 0.0  ;;  %v839_v38 = vmax.f32 %v807_v28, 0.0 }
 0x12d   : > { %v1389_v33 = vpop.f32.mrf.mxu0  ;;  %v1405_v34 = vpop.f32.mrf.mxu1 }
 0x12e   : > { %v792_v35 = vadd.f32 %v1389_v33, %v1898_v24  ;;  %v808_v36 = vadd.f32 %v1405_v34, %v1898_v24  ;;  %v821_v45 = vmax.f32 %v789_v31, 0.0  ;;  %v837_v46 = vmax.f32 %v805_v32, 0.0 }
 0x12f   : > { %v559_v39 = vpop.f32.mrf.mxu0  ;;  %v623_v40 = vpop.f32.mrf.mxu1 }
 0x130   : > { %v824_v41 = vmax.f32 %v792_v35, 0.0  ;;  %v840_v42 = vmax.f32 %v808_v36, 0.0  ;;  %v790_v43 = vadd.f32 %v1898_v24, %v559_v39  ;;  %v806_v44 = vadd.f32 %v1898_v24, %v623_v40 }
 0x131   : > { %v1392_v47 = vpop.f32.mrf.mxu0  ;;  %v1408_v48 = vpop.f32.mrf.mxu1 }
 0x132   : > { %v1259_v49 = vpack.c.bf16 %v824_v41, %v823_v37  ;;  %v1299_v50 = vpack.c.bf16 %v840_v42, %v839_v38  ;;  %v822_v51 = vmax.f32 %v790_v43, 0.0  ;;  %v838_v52 = vmax.f32 %v806_v44, 0.0 }
 0x133   : > { %v795_v53 = vadd.f32 %v1392_v47, %v1898_v24  ;;  %v811_v54 = vadd.f32 %v1408_v48, %v1898_v24  ;;  %v572_v55 = vpop.f32.mrf.mxu0  ;;  %v636_v56 = vpop.f32.mrf.mxu1 }
 0x134   : > { %1331 = vst [vmem:[%s1912_s20 + $0x8] sm:$0xff] %v1259_v49   ;;  %1339 = vst [vmem:[%s1912_s20 + $0x48] sm:$0xff] %v1299_v50   ;;  %v1254_v57 = vpack.c.bf16 %v822_v51, %v821_v45  ;;  %v1294_v58 = vpack.c.bf16 %v838_v52, %v837_v46  ;;  %v793_v59 = vadd.f32 %v1898_v24, %v572_v55 }
 0x135   : > { %v809_v60 = vadd.f32 %v1898_v24, %v636_v56  ;;  %v1393_v61 = vpop.f32.mrf.mxu0  ;;  %v1409_v62 = vpop.f32.mrf.mxu1  ;;  %v827_v1 = vmax.f32 %v795_v53, 0.0  ;;  %v843_v2 = vmax.f32 %v811_v54, 0.0 }
 0x136   : > { %1255 = vst [vmem:[%s1912_s20] sm:$0xff] %v1254_v57   ;;  %1338 = vst [vmem:[%s1912_s20 + $0x40] sm:$0xff] %v1294_v58   ;;  %v796_v63 = vadd.f32 %v1393_v61, %v1898_v24  ;;  %v812_v0 = vadd.f32 %v1409_v62, %v1898_v24  ;;  %v825_v9 = vmax.f32 %v793_v59, 0.0 }
 0x137   : > { %v575_v3 = vpop.f32.mrf.mxu0  ;;  %v639_v4 = vpop.f32.mrf.mxu1  ;;  %v841_v10 = vmax.f32 %v809_v60, 0.0 }
 0x138   : > { %v828_v5 = vmax.f32 %v796_v63, 0.0  ;;  %v844_v6 = vmax.f32 %v812_v0, 0.0  ;;  %v794_v7 = vadd.f32 %v1898_v24, %v575_v3  ;;  %v810_v8 = vadd.f32 %v1898_v24, %v639_v4 }
 0x139   : > { %v1396_v11 = vpop.f32.mrf.mxu0  ;;  %v1412_v12 = vpop.f32.mrf.mxu1 }
 0x13a   : > { %v1269_v13 = vpack.c.bf16 %v828_v5, %v827_v1  ;;  %v1309_v14 = vpack.c.bf16 %v844_v6, %v843_v2  ;;  %v826_v15 = vmax.f32 %v794_v7, 0.0  ;;  %v842_v16 = vmax.f32 %v810_v8, 0.0 }
 0x13b   : > { %v799_v17 = vadd.f32 %v1396_v11, %v1898_v24  ;;  %v815_v18 = vadd.f32 %v1412_v12, %v1898_v24  ;;  %v588_v19 = vpop.f32.mrf.mxu0  ;;  %v652_v20 = vpop.f32.mrf.mxu1 }
 0x13c   : > { %1333 = vst [vmem:[%s1912_s20 + $0x18] sm:$0xff] %v1269_v13   ;;  %1341 = vst [vmem:[%s1912_s20 + $0x58] sm:$0xff] %v1309_v14   ;;  %v1264_v21 = vpack.c.bf16 %v826_v15, %v825_v9  ;;  %v1304_v22 = vpack.c.bf16 %v842_v16, %v841_v10  ;;  %v797_v23 = vadd.f32 %v1898_v24, %v588_v19 }
 0x13d   : > { %v813_v25 = vadd.f32 %v1898_v24, %v652_v20  ;;  %v1397_v26 = vpop.f32.mrf.mxu0  ;;  %v1413_v27 = vpop.f32.mrf.mxu1  ;;  %v831_v30 = vmax.f32 %v799_v17, 0.0  ;;  %v847_v31 = vmax.f32 %v815_v18, 0.0 }
 0x13e   : > { %1332 = vst [vmem:[%s1912_s20 + $0x10] sm:$0xff] %v1264_v21   ;;  %1340 = vst [vmem:[%s1912_s20 + $0x50] sm:$0xff] %v1304_v22   ;;  %v800_v28 = vadd.f32 %v1397_v26, %v1898_v24  ;;  %v816_v29 = vadd.f32 %v1413_v27, %v1898_v24  ;;  %v829_v38 = vmax.f32 %v797_v23, 0.0 }
 0x13f   : > { %v591_v32 = vpop.f32.mrf.mxu0  ;;  %v655_v33 = vpop.f32.mrf.mxu1  ;;  %v845_v39 = vmax.f32 %v813_v25, 0.0 }
 0x140   : > { %v832_v34 = vmax.f32 %v800_v28, 0.0  ;;  %v848_v35 = vmax.f32 %v816_v29, 0.0  ;;  %v798_v36 = vadd.f32 %v1898_v24, %v591_v32  ;;  %v814_v37 = vadd.f32 %v1898_v24, %v655_v33 }
 0x141   : > { %v1400_v40 = vpop.f32.mrf.mxu0  ;;  %v1416_v41 = vpop.f32.mrf.mxu1 }
 0x142   : > { %v1279_v42 = vpack.c.bf16 %v832_v34, %v831_v30  ;;  %v1319_v43 = vpack.c.bf16 %v848_v35, %v847_v31  ;;  %v830_v44 = vmax.f32 %v798_v36, 0.0  ;;  %v846_v45 = vmax.f32 %v814_v37, 0.0 }
 0x143   : > { %v803_v46 = vadd.f32 %v1400_v40, %v1898_v24  ;;  %v819_v47 = vadd.f32 %v1416_v41, %v1898_v24  ;;  %v604_v48 = vpop.f32.mrf.mxu0  ;;  %v668_v49 = vpop.f32.mrf.mxu1 }
 0x144   : > { %1335 = vst [vmem:[%s1912_s20 + $0x28] sm:$0xff] %v1279_v42   ;;  %1343 = vst [vmem:[%s1912_s20 + $0x68] sm:$0xff] %v1319_v43   ;;  %v1274_v50 = vpack.c.bf16 %v830_v44, %v829_v38  ;;  %v1314_v51 = vpack.c.bf16 %v846_v45, %v845_v39  ;;  %v801_v52 = vadd.f32 %v1898_v24, %v604_v48 }
 0x145   : > { %v817_v53 = vadd.f32 %v1898_v24, %v668_v49  ;;  %v1401_v54 = vpop.f32.mrf.mxu0  ;;  %v1417_v55 = vpop.f32.mrf.mxu1  ;;  %v835_v58 = vmax.f32 %v803_v46, 0.0  ;;  %v851_v59 = vmax.f32 %v819_v47, 0.0 }
 0x146   : > { %1334 = vst [vmem:[%s1912_s20 + $0x20] sm:$0xff] %v1274_v50   ;;  %1342 = vst [vmem:[%s1912_s20 + $0x60] sm:$0xff] %v1314_v51   ;;  %v804_v56 = vadd.f32 %v1401_v54, %v1898_v24  ;;  %v820_v57 = vadd.f32 %v1417_v55, %v1898_v24  ;;  %v833_v2 = vmax.f32 %v801_v52, 0.0 }
 0x147   : > { %v607_v60 = vpop.f32.mrf.mxu0  ;;  %v671_v61 = vpop.f32.mrf.mxu1  ;;  %v849_v3 = vmax.f32 %v817_v53, 0.0 }
 0x148   : > { %v836_v62 = vmax.f32 %v804_v56, 0.0  ;;  %v852_v63 = vmax.f32 %v820_v57, 0.0  ;;  %v802_v0 = vadd.f32 %v1898_v24, %v607_v60  ;;  %v818_v1 = vadd.f32 %v1898_v24, %v671_v61 }
 0x14a   : > { %v1289_v4 = vpack.c.bf16 %v836_v62, %v835_v58  ;;  %v1329_v5 = vpack.c.bf16 %v852_v63, %v851_v59  ;;  %v834_v6 = vmax.f32 %v802_v0, 0.0  ;;  %v850_v7 = vmax.f32 %v818_v1, 0.0 }
 0x14c   : > { %1337 = vst [vmem:[%s1912_s20 + $0x38] sm:$0xff] %v1289_v4   ;;  %1345 = vst [vmem:[%s1912_s20 + $0x78] sm:$0xff] %v1329_v5   ;;  %v1284_v24 = vpack.c.bf16 %v834_v6, %v833_v2  ;;  %v1324_v8 = vpack.c.bf16 %v850_v7, %v849_v3 }
 0x14e   : > { %1336 = vst [vmem:[%s1912_s20 + $0x30] sm:$0xff] %v1284_v24   ;;  %1344 = vst [vmem:[%s1912_s20 + $0x70] sm:$0xff] %v1324_v8  }
 0x14f   : > { %1638 = shalt.err (!%p1635_p2)
}
 0x150   : > { %s1639_s19 = scalar_lea.hbm %s1953_s9, 2048  ;;  %s1643_s4 = scalar_lea.hbm %s2009_s3, 524288 }
 0x151   : > { %p1640_p9 = scmp.ne.s32.totalorder %s1953_s9, %s1639_s19  ;;  %p1644_p13 = scmp.lt.s32.totalorder %s1953_s9, %s2009_s3 }
 0x152   : > { %p1645_p7 = scmp.lt.s32.totalorder %s1643_s4, %s1639_s19 }
 0x153   : > { %p1641_p11 = pnand %p1640_p9, %p1836_p5 }
 0x154   : > { %p1646_p3 = por %p1645_p7, %p1644_p13 }
 0x155   : > { %p1642_p12 = pneg %p1641_p11 }
 0x157   : > { %p1647_p1 = pnand %p1646_p3, %p1642_p12 }
 0x159   : > { %1650 = shalt.err (!%p1647_p1)
}
 0x15a   : > { %s1717_s20 = smov 64   ;;  %s1718_s22 = smov 4  }
 0x15b   : > { %1444 = dma.vmem_to_hbm [thread:$0]  (%p1836_p5), %s1955_s24, 2048, %s1953_s9, %s1014_s15, %s1717_s20, %s1717_s20, %s1718_s22  }
 0x15c PF: > { %p1466_p4 = scmp.ge.s32.totalorder %s1709_s17, 2  ;;  %s1043_s5 = sand.u32 1, %s1689_s12  }
 0x15d   : > { %p2020_p6 = scmp.ne.s32.totalorder %s2014_s23, 0  ;;  %s1044_s8 = scalar_lea.sflag [#allocation5], %s1043_s5 }
 0x15f   : > { %p1458_p8 = pnand %p1466_p4, %p2020_p6 }
 0x161   : > { %p1459_p0 = pneg %p1458_p8 }
 0x163   : > { %1684 = dma.done.wait (%p1459_p0), %s1044_s8, 2048  }
 0x164   : > { %1686 = vsyncadd (%p1459_p0), %s1044_s8, 4294965248  ;;  %s20_s17 = sadd.s32 1, %s1709_s17   ;;  %s2021_s12 = smov %s1693_s13 }
 0x165   : > { %p17_p10 = scmp.ge.s32.totalorder %s20_s17, 258   ;;  %s2022_s13 = smov %s1697_s14 }
 0x166   : > { %s2023_s14 = smov %s1845_s30  ;;  %s2024_s15 = smov %s1705_s16 }
 0x167   : > { %s2025_s16 = smov %s2027_s18  ;;  %19 = sbr.rel (!%p17_p10) target bundleno = 7 (0x7), region = 95 }
 0x16c   :  { %1049 = vsyncpa [#allocation4], 1 }
 0x16d   :  { %1051 = vsyncpa [#allocation4 + $0x1], 1 }
 0x16e   :  { %1052 = vsyncpa [#allocation7], 1 }
 0x16f   :  { %1053 = vsyncpa [#allocation5], 1 }
 0x170   :  { %1055 = vsyncpa [#allocation5 + $0x1], 1 }

</bundles_post_ra>
